<compile_context>
chip_gen: v5e
topology: v5e:2x2
jax: 0.10.0
libtpu: 0.0.40
codegen_flags: <defaults>
</compile_context>

<pallas_src>
import functools

import jax
import jax.numpy as jnp
from jax.experimental import pallas as pl
from jax.experimental.pallas import tpu as pltpu


def _round_up(a: int, b: int) -> int:
    return (a + b - 1) // b * b


def _choose_tile_n(n: int, max_tile_n: int, k_pad: int, c: int) -> int:
    """Pick the batch tile: big enough to amortize per-step overhead, small
    enough to fit the VMEM budget, and (when n permits) >= 2 grid steps so the
    'parallel' grid axis can be sharded across v7x's two TensorCores."""
    if n <= 16:
        return n  # single full-extent block (block dims == array dims)
    tile_n = min(max_tile_n, _round_up((n + 1) // 2, 16))
    # VMEM guard (v7x has 64 MiB/TC, scoped limit set to 48 MiB below):
    # ~6 f32 (TILE_N, K_pad) elementwise temporaries + double-buffered bf16 x.
    while tile_n > 256 and (6 * tile_n * k_pad * 4 + 4 * tile_n * c * 2) > 40 * 2**20:
        tile_n = _round_up(tile_n // 2, 16)
    return tile_n


def _cos_head_kernel(x_ref, w_ref, bias_ref, label_ref, loss_ref, *,
                     temperature: float, eps: float,
                     num_rows: int, tile_n: int):
    i = pl.program_id(0)

    x = x_ref[...]                                   # (TILE_N, C)   bf16 (or f32)
    w = w_ref[...]                                   # (C, K_pad)    bf16, weight_norm folded
    col_bias = bias_ref[...]                         # (1, K_pad)    f32: 0 valid / -1e30 pad
    labels = label_ref[...]                          # (TILE_N, 1)   int32

    # Raw scores on the MXU: bf16 operands, f32 accumulation.  The weight is
    # already in (C, K_pad) layout, so no per-step RHS transpose/XLU work.
    scores = jnp.dot(x.astype(jnp.bfloat16), w,
                     preferred_element_type=jnp.float32)          # (TILE_N, K_pad)

    # Fold x / (||x|| + eps) and temperature into a per-row scale.
    # Norm accumulated in f32 from the bf16 tile; exact divide (no approx rcp).
    xf = x.astype(jnp.float32)
    x_norm = jnp.sqrt(jnp.sum(xf * xf, axis=1, keepdims=True))    # (TILE_N, 1)
    row_scale = temperature / (x_norm + eps)

    # Padded class columns are suppressed by a broadcast additive bias.
    logits = scores * row_scale + col_bias                        # (TILE_N, K_pad)

    # Cross entropy per row: logsumexp - target logit.
    m = jnp.max(logits, axis=1, keepdims=True)                    # (TILE_N, 1)
    lse = m + jnp.log(jnp.sum(jnp.exp(logits - m), axis=1, keepdims=True))
    col_ids = jax.lax.broadcasted_iota(jnp.int32, logits.shape, 1)
    tgt = jnp.sum(jnp.where(col_ids == labels, logits, 0.0),
                  axis=1, keepdims=True)                          # (TILE_N, 1)
    per_row = lse - tgt

    # Mask rows past the true batch size (ragged last tile: Pallas only DMAs
    # the valid rows, the rest of the VMEM buffer is stale -> zeroed here).
    row_ids = i * tile_n + jax.lax.broadcasted_iota(jnp.int32, (tile_n, 1), 0)
    per_row = jnp.where(row_ids < num_rows, per_row, 0.0)

    # Lane-dense output: one partial sum per grid step, broadcast across the
    # 128-lane output block -> a single unmasked full-width store.
    partial = jnp.sum(per_row, axis=0, keepdims=True)             # (1, 1)
    loss_ref[...] = partial + jnp.zeros((1, 128), jnp.float32)


def cos_distance_head_loss(x, v, g, labels, *, temperature, eps=1e-5,
                           max_tile_n=2048):
    """x: (N, C) float (bf16 preferred), v: (K, C), g: (K, 1), labels: (N,) int.

    Returns the scalar f32 cross-entropy loss of the CosDistanceHead forward.
    """
    n, c = x.shape
    k = v.shape[0]
    k_pad = _round_up(k, 128)

    tile_n = _choose_tile_n(n, max_tile_n, k_pad, c)
    num_tiles = pl.cdiv(n, tile_n)

    # weight_norm folded ONCE into the weight: W = g * v / ||v|| in f32, padded
    # along classes, transposed to (C, K_pad), cast to bf16 for the MXU.
    v32 = v.astype(jnp.float32)
    g32 = g.astype(jnp.float32).reshape(k, 1)
    w = v32 * (g32 * jax.lax.rsqrt(jnp.sum(v32 * v32, axis=1, keepdims=True)))
    w_t = jnp.pad(w, ((0, k_pad - k), (0, 0))).T.astype(jnp.bfloat16)   # (C, K_pad)

    # Additive bias for padded class columns (tiny, VMEM-resident).
    col_bias = jnp.where(jnp.arange(k_pad) < k, 0.0, -1e30)
    col_bias = col_bias.astype(jnp.float32).reshape(1, k_pad)

    labels2d = labels.astype(jnp.int32).reshape(n, 1)

    kernel = functools.partial(
        _cos_head_kernel, temperature=float(temperature), eps=float(eps),
        num_rows=n, tile_n=tile_n)

    partials = pl.pallas_call(
        kernel,
        out_shape=jax.ShapeDtypeStruct((1, num_tiles * 128), jnp.float32),
        grid=(num_tiles,),
        in_specs=[
            pl.BlockSpec((tile_n, c), lambda i: (i, 0)),     # x tile (pipelined)
            pl.BlockSpec((c, k_pad), lambda i: (0, 0)),      # weight (VMEM resident)
            pl.BlockSpec((1, k_pad), lambda i: (0, 0)),      # class-pad bias (resident)
            pl.BlockSpec((tile_n, 1), lambda i: (i, 0)),     # labels tile
        ],
        out_specs=pl.BlockSpec((1, 128), lambda i: (0, i)),  # lane-dense partial sums
        compiler_params=pltpu.CompilerParams(
            dimension_semantics=("parallel",),
            vmem_limit_bytes=48 * 1024 * 1024),
    )(x, w_t, col_bias, labels2d)

    # One partial sum per grid step (each broadcast across 128 lanes); the final
    # tiny reduction and the mean over the true batch size run in XLA.
    return jnp.sum(partials.reshape(num_tiles, 128)[:, 0]) / n


def _reference_loss(x, v, g, labels, *, temperature, eps=1e-5):
    """Pure-JAX f32 reference of the PyTorch forward, for validation."""
    w = v * (g / jnp.linalg.norm(v, axis=1, keepdims=True))
    x_n = x / (jnp.linalg.norm(x, axis=1, keepdims=True) + eps)
    scores = temperature * (x_n @ w.T)
    logz = jax.scipy.special.logsumexp(scores, axis=1)
    tgt = jnp.take_along_axis(scores, labels[:, None], axis=1)[:, 0]
    return jnp.mean(logz - tgt)


if __name__ == "__main__":
    # Module config (num_classes <= 200 -> temperature defaults to 2).
    num_classes = 16
    in_channels = 32
    temperature = 2.0
    eps = 1e-5
    batch = 8

    key = jax.random.PRNGKey(0)
    kx, kv, kl = jax.random.split(key, 3)

    x = jax.random.normal(kx, (batch, in_channels), dtype=jnp.float32)
    # nn.Linear weight analogue; weight_norm init sets g to the per-row norm.
    v = jax.random.normal(kv, (num_classes, in_channels), dtype=jnp.float32) * 0.1
    g = jnp.linalg.norm(v, axis=1, keepdims=True)
    labels = jax.random.randint(kl, (batch,), 0, num_classes, dtype=jnp.int32)

    # The kernel streams x in bf16 (the HBM-bound resource).  In a real model
    # the producing layer would emit bf16 directly; here we cast at the call
    # site to model that producer.
    loss = cos_distance_head_loss(x.astype(jnp.bfloat16), v, g, labels,
                                  temperature=temperature, eps=eps)
    loss = jax.block_until_ready(loss)

    ref = _reference_loss(x, v, g, labels, temperature=temperature, eps=eps)
    # bf16 x / bf16 weight MXU operands vs the f32 reference -> loose tolerance.
    assert jnp.abs(loss - ref) < 2e-2, (loss, ref)

    print("KERNEL_OK")
</pallas_src>

<mosaic_0001>
module attributes {stable_mosaic.version = 11 : i64} {
  func.func @_cos_head_kernel(%arg0: i32, %arg1: memref<8x32xbf16, #tpu.memory_space<vmem>>, %arg2: memref<32x128xbf16, #tpu.memory_space<vmem>>, %arg3: memref<1x128xf32, #tpu.memory_space<vmem>>, %arg4: memref<8x1xi32, #tpu.memory_space<vmem>>, %arg5: memref<1x128xf32, #tpu.memory_space<vmem>>) attributes {dimension_semantics = [#tpu.dimension_semantics<parallel>], iteration_bounds = array<i64: 1>, scalar_prefetch = 0 : i64, scratch_operands = 0 : i64, tpu.core_type = #tpu.core_type<tc>, window_params = [{transform_indices = @transform_0, window_bounds = array<i64: 8, 32>}, {pipeline_mode = #tpu.pipeline_mode<synchronous>, transform_indices = @transform_1, window_bounds = array<i64: 32, 128>}, {pipeline_mode = #tpu.pipeline_mode<synchronous>, transform_indices = @transform_2, window_bounds = array<i64: 1, 128>}, {transform_indices = @transform_3, window_bounds = array<i64: 8, 1>}, {transform_indices = @transform_4, window_bounds = array<i64: 1, 128>}]} {
    %c0 = arith.constant 0 : index
    %c0_0 = arith.constant 0 : index
    %0 = vector.load %arg1[%c0, %c0_0] : memref<8x32xbf16, #tpu.memory_space<vmem>>, vector<8x32xbf16>
    %c0_1 = arith.constant 0 : index
    %c0_2 = arith.constant 0 : index
    %1 = vector.load %arg2[%c0_1, %c0_2] : memref<32x128xbf16, #tpu.memory_space<vmem>>, vector<32x128xbf16>
    %c0_3 = arith.constant 0 : index
    %c0_4 = arith.constant 0 : index
    %2 = vector.load %arg3[%c0_3, %c0_4] : memref<1x128xf32, #tpu.memory_space<vmem>>, vector<1x128xf32>
    %c0_5 = arith.constant 0 : index
    %c0_6 = arith.constant 0 : index
    %3 = vector.load %arg4[%c0_5, %c0_6] : memref<8x1xi32, #tpu.memory_space<vmem>>, vector<8x1xi32>
    %cst = arith.constant dense<0.000000e+00> : vector<8x128xf32>
    %4 = tpu.matmul %0, %1, %cst {dimension_numbers = #tpu.dot_dimension_numbers<[1], [0], [0], [1], [0, 0, 1, 1], [], []>} : vector<8x32xbf16>, vector<32x128xbf16>, vector<8x128xf32> -> vector<8x128xf32>
    %5 = arith.extf %0 : vector<8x32xbf16> to vector<8x32xf32>
    %6 = arith.mulf %5, %5 : vector<8x32xf32>
    %cst_7 = arith.constant dense<0.000000e+00> : vector<8xf32>
    %7 = vector.multi_reduction <add>, %6, %cst_7 [1] : vector<8x32xf32> to vector<8xf32>
    %8 = vector.shape_cast %7 : vector<8xf32> to vector<8x1xf32>
    %9 = math.sqrt %8 : vector<8x1xf32>
    %cst_8 = arith.constant 9.99999974E-6 : f32
    %10 = vector.broadcast %cst_8 : f32 to vector<8x1xf32>
    %11 = arith.addf %9, %10 : vector<8x1xf32>
    %cst_9 = arith.constant 2.000000e+00 : f32
    %12 = vector.broadcast %cst_9 : f32 to vector<8x1xf32>
    %13 = arith.divf %12, %11 : vector<8x1xf32>
    %14 = vector.broadcast %13 : vector<8x1xf32> to vector<8x128xf32>
    %15 = arith.mulf %4, %14 : vector<8x128xf32>
    %16 = vector.broadcast %2 : vector<1x128xf32> to vector<8x128xf32>
    %17 = arith.addf %15, %16 : vector<8x128xf32>
    %cst_10 = arith.constant dense<0xFF800000> : vector<8xf32>
    %18 = vector.multi_reduction <maximumf>, %17, %cst_10 [1] : vector<8x128xf32> to vector<8xf32>
    %19 = vector.shape_cast %18 : vector<8xf32> to vector<8x1xf32>
    %20 = vector.broadcast %19 : vector<8x1xf32> to vector<8x128xf32>
    %21 = arith.subf %17, %20 : vector<8x128xf32>
    %22 = math.exp %21 : vector<8x128xf32>
    %cst_11 = arith.constant dense<0.000000e+00> : vector<8xf32>
    %23 = vector.multi_reduction <add>, %22, %cst_11 [1] : vector<8x128xf32> to vector<8xf32>
    %24 = vector.shape_cast %23 : vector<8xf32> to vector<8x1xf32>
    %25 = math.log %24 : vector<8x1xf32>
    %26 = arith.addf %19, %25 : vector<8x1xf32>
    %27 = tpu.iota {dimensions = array<i32: 1>} : vector<8x128xi32>
    %28 = vector.broadcast %3 : vector<8x1xi32> to vector<8x128xi32>
    %29 = arith.cmpi eq, %27, %28 : vector<8x128xi32>
    %cst_12 = arith.constant 0.000000e+00 : f32
    %30 = vector.broadcast %cst_12 : f32 to vector<8x128xf32>
    %31 = arith.select %29, %17, %30 : vector<8x128xi1>, vector<8x128xf32>
    %cst_13 = arith.constant dense<0.000000e+00> : vector<8xf32>
    %32 = vector.multi_reduction <add>, %31, %cst_13 [1] : vector<8x128xf32> to vector<8xf32>
    %33 = vector.shape_cast %32 : vector<8xf32> to vector<8x1xf32>
    %34 = arith.subf %26, %33 : vector<8x1xf32>
    %c8_i32 = arith.constant 8 : i32
    %35 = arith.muli %arg0, %c8_i32 : i32
    %36 = tpu.iota {dimensions = array<i32: 0>} : vector<8x1xi32>
    %37 = vector.broadcast %35 : i32 to vector<8x1xi32>
    %38 = arith.addi %37, %36 : vector<8x1xi32>
    %c8_i32_14 = arith.constant 8 : i32
    %39 = vector.broadcast %c8_i32_14 : i32 to vector<8x1xi32>
    %40 = arith.cmpi slt, %38, %39 : vector<8x1xi32>
    %cst_15 = arith.constant 0.000000e+00 : f32
    %41 = vector.broadcast %cst_15 : f32 to vector<8x1xf32>
    %42 = arith.select %40, %34, %41 : vector<8x1xi1>, vector<8x1xf32>
    %cst_16 = arith.constant dense<0.000000e+00> : vector<1xf32>
    %43 = vector.multi_reduction <add>, %42, %cst_16 [0] : vector<8x1xf32> to vector<1xf32>
    %44 = vector.shape_cast %43 : vector<1xf32> to vector<1x1xf32>
    %cst_17 = arith.constant 0.000000e+00 : f32
    %45 = vector.broadcast %cst_17 : f32 to vector<1x128xf32>
    %46 = vector.broadcast %44 : vector<1x1xf32> to vector<1x128xf32>
    %47 = arith.addf %46, %45 : vector<1x128xf32>
    %c0_18 = arith.constant 0 : index
    %c0_19 = arith.constant 0 : index
    %48 = vector.load %arg5[%c0_18, %c0_19] : memref<1x128xf32, #tpu.memory_space<vmem>>, vector<1x128xf32>
    tpu.vector_store %arg5[%c0_18, %c0_19], %47 {strides = array<i32>} : memref<1x128xf32, #tpu.memory_space<vmem>>, vector<1x128xf32>,
    return
  }
  func.func @transform_0(%arg0: i32) -> (i32, i32) {
    %c0_i32 = arith.constant 0 : i32
    %c0_i32_0 = arith.constant 0 : i32
    return %arg0, %c0_i32 : i32, i32
  }
  func.func @transform_1(%arg0: i32) -> (i32, i32) {
    %c0_i32 = arith.constant 0 : i32
    %c0_i32_0 = arith.constant 0 : i32
    %c0_i32_1 = arith.constant 0 : i32
    return %c0_i32, %c0_i32_0 : i32, i32
  }
  func.func @transform_2(%arg0: i32) -> (i32, i32) {
    %c0_i32 = arith.constant 0 : i32
    %c0_i32_0 = arith.constant 0 : i32
    %c0_i32_1 = arith.constant 0 : i32
    return %c0_i32, %c0_i32_0 : i32, i32
  }
  func.func @transform_3(%arg0: i32) -> (i32, i32) {
    %c0_i32 = arith.constant 0 : i32
    %c0_i32_0 = arith.constant 0 : i32
    return %arg0, %c0_i32 : i32, i32
  }
  func.func @transform_4(%arg0: i32) -> (i32, i32) {
    %c0_i32 = arith.constant 0 : i32
    %c0_i32_0 = arith.constant 0 : i32
    return %c0_i32, %arg0 : i32, i32
  }
}

</mosaic_0001>

<bundles_post_ra>
// kernel: tpu_custom_call.1
= control target key start
LH: loop header
LB: loop body
LE: loop exit
PB: predicated region body
PF: predicated region fallthrough
CT: control target
= control target key end

     0   :  { %9 = vsyncpa [#allocation3], 0  ;;  %s285_s0 = inlined_call_operand.vmem [shape: bf16[8,32], index: 0, kind: input, shape index: {}]   ;;  %s286_s1 = inlined_call_operand.hbm [shape: bf16[32,128], index: 1, kind: input, shape index: {}]   ;;  %s287_s2 = inlined_call_operand.vmem [shape: f32[1,128], index: 2, kind: input, shape index: {}]   ;;  %s288_s3 = inlined_call_operand.vmem [shape: s32[8,1], index: 3, kind: input, shape index: {}]   ;;  %s289_s4 = inlined_call_operand.hbm [shape: f32[1,128], index: 4, kind: output, shape index: {}]  }
   0x1   :  { %10 = vsyncpa [#allocation4], 0  ;;  %s17_s17 = sshll.u32 %s286_s1, 4  ;;  %s240_s18 = smov [#allocation2]   ;;  %s18_s17 = int_to_ptr.hbm [resolvable:$true] %s17_s17 }
   0x2   :  { %s19_s19 = sshll.u32 %s240_s18, 4  ;;  %s241_s20 = smov 64   ;;  %s20_s19 = int_to_ptr.vmem [resolvable:$true] %s19_s19 }
   0x3   :  { %s242_s21 = smov 4  }
   0x4   :  { %25 = dma.hbm_to_vmem [thread:$0]  %s18_s17, 256, %s20_s19, [#allocation3], %s241_s20, %s241_s20, %s242_s21  }
   0x5   :  { %236 = dma.done.wait [#allocation3], 256  }
   0x6   :  { %237 = vsyncadd [#allocation3], 4294967040  ;;  %v243_v0 = vmov 0   ;;  %v35_v1 = vld [vmem:[%s285_s0] sm:$0xf]  ;;  %v171_v2 = vld [vmem:[#allocation2 + $0x8] sm:$0xff]  ;;  %v119_v28 = vlaneseq }
   0x7   :  { %177 = vset.pattern.permute.xlu1 %v243_v0  ;;  %178 = vset.pattern.permute.xlu0 %v243_v0  ;;  %v71_v3 = vunpack.c.l.bf16 %v35_v1  ;;  %v41_v4 = vld [vmem:[%s288_s3] sm:$0xff]  ;;  %vm54_vm0 = vcmask 261120   ;;  %s151_s28 = sshll.u32 %s289_s4, 4  ;;  %s152_s28 = int_to_ptr.hbm [resolvable:$true] %s151_s28 }
   0x8   :  { %64 = vmatpush.bf16.msra.mxu0 %v171_v2  ;;  %v170_v5 = vld [vmem:[#allocation2] sm:$0xff]  ;;  %122 = vperm.xlu1 %177, %v41_v4   ;;  %v120_v33 = vand.u32 127, %v119_v28 }
   0x9   :  { %v72_v6 = vmul.f32 %v71_v3, %v71_v3  ;;  %v179_v35 = vld [vmem:[%s287_s2] ss:$0 sm:$0xff]  ;;  %s244_s2 = smov [#allocation5]  }
   0xa   :  { %s149_s25 = sshll.u32 %s244_s2, 4  ;;  %s150_s25 = int_to_ptr.vmem [resolvable:$true] %s149_s25 }
   0xb   :  { %v73_v7 = vsel %vm54_vm0, %v72_v6, 0.0 }
   0xc   :  { %74 = vadd.xlane.f32.xlu0 %v73_v7  ;;  %65 = vmatpush.bf16.msra.mxu0 %v170_v5 }
   0xf   :  { %169 = vmatmul.msk.bf16.vlgmr.msra.gmra.mxu0 %vm54_vm0, %v35_v1 }
  0x7a   :  { %v123_v36 = vpop.permute.xlu1 %122 }
  0x7b   :  { %vm124_vm7 = vcmp.eq.s32.totalorder %v120_v33, %v123_v36 }
  0x7f   :  { %v75_v8 = vpop.xlane.xlu0 %74 }
  0x80   :  { %180 = vrsqrt.f32 %v75_v8  ;;  %vm83_vm1 = vcmp.eq.f32.partialorder %v75_v8, inf  ;;  %v86_v17 = vand.u32 2147483648, %v75_v8  ;;  %vm85_vm2 = vcmp.eq.f32.partialorder %v75_v8, 0.0 }
  0x86   :  { %v181_v9 = vpop.eup %180 }
  0x87   :  { %v77_v10 = vmul.f32 %v181_v9, %v75_v8 }
  0x89   :  { %v78_v11 = vmul.f32 %v181_v9, %v77_v10 }
  0x8b   :  { %v79_v12 = vmul.f32 0.5, %v78_v11 }
  0x8c   :  { %v67_v13 = vpop.f32.mrf.mxu0 }
  0x8d   :  { %v80_v14 = vsub.f32 1.5, %v79_v12 }
  0x8f   :  { %v81_v15 = vmul.f32 %v181_v9, %v80_v14 }
  0x91   :  { %v82_v16 = vmul.f32 %v81_v15, %v75_v8 }
  0x93   :  { %v84_v18 = vsel %vm83_vm1, %v75_v8, %v82_v16 }
  0x94   :  { %v87_v19 = vsel %vm85_vm2, %v86_v17, %v84_v18  ;;  %v69_v20 = vpop.f32.mrf.mxu0 }
  0x95   :  { %v88_v21 = vadd.f32 1e-05, %v87_v19 }
  0x97   :  { %182 = vrcp.f32 %v88_v21  ;;  %v100_v25 = vand.u32 2147483648, %v88_v21  ;;  %v98_v27 = vand.u32 2147483647, %v88_v21  ;;  %vm94_vm4 = vweird.f32 %v88_v21 }
  0x99   :  { %v101_v30 = vor.u32 1.1754944e-38, %v100_v25  ;;  %vm99_vm6 = vcmp.eq.f32.partialorder %v98_v27, 8.507059e+37 }
  0x9d   :  { %v183_v22 = vpop.eup %182 }
  0x9e   :  { %v90_v23 = vmul.f32 %v183_v22, %v88_v21  ;;  %vm95_vm3 = vweird.f32 %v183_v22 }
  0x9f   :  { %vm96_vm5 = vmor %vm94_vm4, %vm95_vm3 }
  0xa0   :  { %v91_v24 = vsub.f32 1.0, %v90_v23 }
  0xa2   :  { %v92_v26 = vmul.f32 %v183_v22, %v91_v24 }
  0xa4   :  { %v93_v29 = vadd.f32 %v183_v22, %v92_v26 }
  0xa6   :  { %v97_v31 = vsel %vm96_vm5, %v183_v22, %v93_v29 }
  0xa7   :  { %v102_v32 = vsel %vm99_vm6, %v101_v30, %v97_v31 }
  0xa8   :  { %v103_v34 = vmul.f32 2.0, %v102_v32 }
  0xaa   :  { %v104_v37 = vmul.f32 %v103_v34, %v67_v13 }
  0xac   :  { %v108_v38 = vadd.f32 %v179_v35, %v104_v37 }
  0xae   :  { %109 = vmax.xlane.f32.xlu0 %v108_v38  ;;  %v125_v39 = vsel %vm124_vm7, %v108_v38, 0.0 }
  0xaf   :  { %126 = vadd.xlane.f32.xlu2 %v125_v39 }
 0x121   :  { %v110_v40 = vpop.xlane.xlu0 %109 }
 0x122   :  { %v111_v41 = vsub.f32 %v108_v38, %v110_v40  ;;  %v127_v48 = vpop.xlane.xlu2 %126 }
 0x124   :  { %v112_v42 = vmul.f32 1.442695, %v111_v41 }
 0x126   :  { %184 = vpow2.f32 %v112_v42 }
 0x12c   :  { %v185_v43 = vpop.eup %184 }
 0x12d   :  { %114 = vadd.xlane.f32.xlu1 %v185_v43 }
 0x1a0   :  { %v115_v44 = vpop.xlane.xlu1 %114 }
 0x1a1   :  { %186 = vlog2.f32 %v115_v44 }
 0x1a7   :  { %v187_v45 = vpop.eup %186 }
 0x1a8   :  { %v117_v46 = vmul.f32 0.6931472, %v187_v45 }
 0x1aa   :  { %v118_v47 = vadd.f32 %v117_v46, %v110_v40 }
 0x1ac   :  { %v128_v49 = vsub.f32 %v118_v47, %v127_v48 }
 0x1ae   :  { %v136_v50 = vrot.slane %v128_v49, 4 }
 0x1b0   :  { %v137_v51 = vadd.f32 %v136_v50, %v128_v49 }
 0x1b2   :  { %v138_v52 = vrot.slane %v137_v51, 2 }
 0x1b4   :  { %v139_v53 = vadd.f32 %v138_v52, %v137_v51 }
 0x1b6   :  { %v140_v54 = vrot.slane %v139_v53, 1 }
 0x1b8   :  { %v141_v55 = vadd.f32 %v140_v54, %v139_v53 }
 0x1ba   :  { %143 = vst [vmem:[#allocation5] sm:$0x1] %v141_v55 }
 0x1bb   :  { %154 = dma.vmem_to_hbm [thread:$0]  %s150_s25, 16, %s152_s28, [#allocation4]  }
 0x1bc   :  { %238 = dma.done.wait [#allocation4], 16  }
 0x1bd   :  { %239 = vsyncadd [#allocation4], 4294967280 }
 0x1be   :  { %159 = vsyncpa [#allocation3], 1 }
 0x1bf   :  { %160 = vsyncpa [#allocation4], 1 }

</bundles_post_ra>
